<compile_context>
chip_gen: v6e
topology: v6e:2x2x1
jax: 0.10.0
libtpu: 0.0.40
codegen_flags: <defaults>
</compile_context>

<pallas_src>
import functools

import jax
import jax.numpy as jnp
from jax.experimental import pallas as pl
from jax.experimental.pallas import tpu as pltpu


_VMEM_LIMIT_BYTES = 32 * 1024 * 1024    # explicit scoped-VMEM limit (portable: v5e/v6e/v7x)
_VMEM_BUDGET_BYTES = 20 * 1024 * 1024   # target working set, headroom under the limit


def _round_up(a, b):
    return (a + b - 1) // b * b


def _pick_tile(requested, c, p, s, budget_bytes):
    """Largest lane-dense (multiple-of-128) token tile that fits the VMEM budget."""
    s128 = _round_up(s, 128)
    # Rough per-token f32 bytes: x (double-buffered) + out (double-buffered) +
    # kernel temps (h, y, ssq) with a 1.5x compiler-temp fudge factor.
    per_tok = 4.0 * (2 * c + 2 * p + 1.5 * (c + p + 2))
    fit = int(budget_bytes / per_tok)
    t = min(int(requested), fit)
    t = max(128, (t // 128) * 128)
    return min(t, s128)


# ---------------------------------------------------------------------------
# Pass 1: u = W1 @ x (bias omitted) + per-(batch, group, channel) partial sums
#         and sums-of-squares for the BatchNorm batch statistics.  h never
#         touches HBM; only the tiny (N, G, C, 1) partials are written.
# ---------------------------------------------------------------------------
def _stats_kernel(x_ref, w1_ref, sum_ref, sq_ref, *,
                  s_total, sg_tiles, tile_s, needs_mask):
    g = pl.program_id(1)
    sj = pl.program_id(2)

    # (C, C) @ (C, tile_s) -> (C, tile_s).  Bias handled analytically in glue.
    u = jnp.dot(w1_ref[...], x_ref[0], preferred_element_type=jnp.float32)

    if needs_mask:
        # Logical token index of each lane column.  This MUST stay a jnp.where
        # (select) applied AFTER the matmul: padded / duplicated (clamped)
        # columns may hold arbitrary garbage (even NaN), but each u column
        # depends only on its own x column, so zeroing here is exact and
        # NaN-safe.  Do not replace with a multiply-by-mask.
        tok = (g * sg_tiles + sj) * tile_s + jax.lax.broadcasted_iota(
            jnp.int32, (1, tile_s), 1)
        u = jnp.where(tok < s_total, u, 0.0)

    @pl.when(sj == 0)
    def _():
        sum_ref[...] = jnp.zeros_like(sum_ref)
        sq_ref[...] = jnp.zeros_like(sq_ref)

    sum_ref[0, 0] += jnp.sum(u, axis=1, keepdims=True)       # (C, 1)
    sq_ref[0, 0] += jnp.sum(u * u, axis=1, keepdims=True)    # (C, 1)


# ---------------------------------------------------------------------------
# Pass 2: conv1 with BN folded into (W1', b1') + ReLU + conv2 + L2 normalize
#         over the projection channels (sublane axis) per token (lane).
# ---------------------------------------------------------------------------
def _fused_kernel(x_ref, w1_ref, b1_ref, w2_ref, b2_ref, o_ref):
    h = jnp.dot(w1_ref[...], x_ref[0], preferred_element_type=jnp.float32)
    h = jnp.maximum(h + b1_ref[...], 0.0)                    # folded BN + ReLU
    y = jnp.dot(w2_ref[...], h, preferred_element_type=jnp.float32)
    y = y + b2_ref[...]                                      # (P, tile_s)
    # F.normalize(p=2, dim=channel): y / max(||y||, 1e-12) == y * rsqrt(max(ssq, 1e-24))
    ssq = jnp.sum(y * y, axis=0, keepdims=True)              # (1, tile_s)
    inv = jax.lax.rsqrt(jnp.maximum(ssq, 1e-24))
    o_ref[0] = (y * inv).astype(o_ref.dtype)


def projection_head_forward(x, w1, b1, gamma, beta, w2, b2, *,
                            tile_s=8192, stats_groups=2, eps=1e-5,
                            out_dtype=jnp.float32):
    """x: (N, C, D, H, W) f32. w1: (C, C) [out,in], w2: (P, C) [out,in].
    Returns (N, P, D, H, W) in out_dtype (default f32; pass bf16 to halve
    write traffic at the cost of PyTorch-exact numerics)."""
    N, C, D, H, W = x.shape
    P = w2.shape[0]
    S = D * H * W

    # Pure view: NCDHW -> (N, C, S); channels on sublanes, tokens on lanes.
    x3 = x.reshape(N, C, S).astype(jnp.float32)

    # Large lane-dense token tile, clamped to fit the VMEM budget and S.
    tile_s = _pick_tile(tile_s, C, P, S, _VMEM_BUDGET_BYTES)
    num_s = pl.cdiv(S, tile_s)

    # Second parallel axis for the stats pass (keeps both v7x TCs busy for small N).
    G = max(1, min(int(stats_groups), num_s))
    SG = pl.cdiv(num_s, G)                       # spatial tiles per group
    needs_mask = (G * SG * tile_s != S)          # covers ragged tail + grid padding
    last_s = num_s - 1

    w1m = w1.astype(jnp.float32)                 # (C, C)  [out, in]
    w2m = w2.astype(jnp.float32)                 # (P, C)  [out, in]
    b2c = b2.astype(jnp.float32).reshape(P, 1)

    # --- Pass 1: per-(batch, group) partial BN statistics --------------------
    sum_u, sum_u2 = pl.pallas_call(
        functools.partial(_stats_kernel, s_total=S, sg_tiles=SG,
                          tile_s=tile_s, needs_mask=needs_mask),
        out_shape=(jax.ShapeDtypeStruct((N, G, C, 1), jnp.float32),
                   jax.ShapeDtypeStruct((N, G, C, 1), jnp.float32)),
        grid_spec=pltpu.PrefetchScalarGridSpec(
            num_scalar_prefetch=0,
            grid=(N, G, SG),
            in_specs=[
                # Clamp the spatial block index so grid padding never produces an
                # OOB block; clamped (duplicate) columns are zeroed by the mask.
                pl.BlockSpec(
                    (1, C, tile_s),
                    lambda n, g, sj: (n, 0, jnp.minimum(g * SG + sj, last_s))),
                pl.BlockSpec((C, C), lambda n, g, sj: (0, 0)),       # W1
            ],
            out_specs=(
                pl.BlockSpec((1, 1, C, 1), lambda n, g, sj: (n, g, 0, 0)),  # sum u
                pl.BlockSpec((1, 1, C, 1), lambda n, g, sj: (n, g, 0, 0)),  # sum u^2
            ),
        ),
        compiler_params=pltpu.CompilerParams(
            dimension_semantics=("parallel", "parallel", "arbitrary"),
            vmem_limit_bytes=_VMEM_LIMIT_BYTES),
    )(x3, w1m)

    # --- Tiny glue: finish the stats reduction and fold BN into conv1 --------
    t_total = jnp.float32(N * S)
    mean_u = jnp.sum(sum_u, axis=(0, 1))[:, 0] / t_total       # (C,)  E[W1@x]
    e_u2 = jnp.sum(sum_u2, axis=(0, 1))[:, 0] / t_total        # (C,)  E[(W1@x)^2]
    # Single-pass E[u^2]-E[u]^2 in f32 (bias-invariant).  For strict parity on
    # very large volumes with |mean| >> std, switch to a centered/compensated form.
    var = jnp.maximum(e_u2 - mean_u * mean_u, 0.0)
    scale = gamma.astype(jnp.float32) / jnp.sqrt(var + eps)
    # mean(h) = mean_u + b1; folded bias = scale*b1 + beta - mean(h)*scale
    #                                    = beta - mean_u*scale.
    w1f = w1m * scale[:, None]
    b1f = (beta.astype(jnp.float32) - mean_u * scale).reshape(C, 1)

    # --- Pass 2: fused conv1' + ReLU + conv2 + L2 normalize -------------------
    out = pl.pallas_call(
        _fused_kernel,
        out_shape=jax.ShapeDtypeStruct((N, P, S), out_dtype),
        grid_spec=pltpu.PrefetchScalarGridSpec(
            num_scalar_prefetch=0,
            grid=(N, num_s),
            in_specs=[
                pl.BlockSpec((1, C, tile_s), lambda n, s: (n, 0, s)),  # x tile
                pl.BlockSpec((C, C), lambda n, s: (0, 0)),             # W1 (BN folded)
                pl.BlockSpec((C, 1), lambda n, s: (0, 0)),             # b1 (BN folded)
                pl.BlockSpec((P, C), lambda n, s: (0, 0)),             # W2
                pl.BlockSpec((P, 1), lambda n, s: (0, 0)),             # b2
            ],
            out_specs=pl.BlockSpec((1, P, tile_s), lambda n, s: (n, 0, s)),
        ),
        compiler_params=pltpu.CompilerParams(
            dimension_semantics=("parallel", "parallel"),
            vmem_limit_bytes=_VMEM_LIMIT_BYTES),
    )(x3, w1f, b1f, w2m, b2c)

    # (N, P, S) -> (N, P, D, H, W): pure reshape, no transpose.
    return out.reshape(N, P, D, H, W)


def _reference(x, w1, b1, gamma, beta, w2, b2, eps=1e-5):
    """Pure-JAX reference matching the PyTorch forward (training-mode BN)."""
    N, C, D, H, W = x.shape
    xt = jnp.transpose(x, (0, 2, 3, 4, 1)).reshape(-1, C)
    h = xt @ w1.T + b1
    mean = h.mean(axis=0)
    var = ((h - mean) ** 2).mean(axis=0)
    hn = (h - mean) / jnp.sqrt(var + eps) * gamma + beta
    hn = jnp.maximum(hn, 0.0)
    y = hn @ w2.T + b2
    y = y / jnp.maximum(jnp.linalg.norm(y, axis=-1, keepdims=True), 1e-12)
    return jnp.transpose(y.reshape(N, D, H, W, -1), (0, 4, 1, 2, 3))


if __name__ == "__main__":
    # Small shapes consistent with the module: dim_in=16, proj_dim=32.
    N, C, D, H, W = 2, 16, 4, 8, 8
    P = 32

    key = jax.random.PRNGKey(0)
    kx, kw1, kb1, kw2, kb2, kx2 = jax.random.split(key, 6)

    x = jax.random.normal(kx, (N, C, D, H, W), dtype=jnp.float32)

    # Conv3d kernel-size-1 weights as (out, in) matrices; BatchNorm3d default init.
    w1 = jax.random.normal(kw1, (C, C), dtype=jnp.float32) * (1.0 / jnp.sqrt(C))
    b1 = jax.random.normal(kb1, (C,), dtype=jnp.float32) * 0.1
    gamma = jnp.ones((C,), dtype=jnp.float32)
    beta = jnp.zeros((C,), dtype=jnp.float32)
    w2 = jax.random.normal(kw2, (P, C), dtype=jnp.float32) * (1.0 / jnp.sqrt(C))
    b2 = jax.random.normal(kb2, (P,), dtype=jnp.float32) * 0.1

    # Main run (single big tile; no ragged tail).
    out = projection_head_forward(x, w1, b1, gamma, beta, w2, b2)
    out = jax.block_until_ready(out)
    ref = _reference(x, w1, b1, gamma, beta, w2, b2)
    assert out.shape == (N, P, D, H, W)
    assert jnp.allclose(out, ref, atol=1e-4, rtol=1e-4), "mismatch vs reference"

    # Second run exercising the ragged-tail mask and the multi-group stats grid.
    x2 = jax.random.normal(kx2, (N, C, 4, 8, 9), dtype=jnp.float32)
    out2 = jax.block_until_ready(
        projection_head_forward(x2, w1, b1, gamma, beta, w2, b2,
                                tile_s=128, stats_groups=2))
    ref2 = _reference(x2, w1, b1, gamma, beta, w2, b2)
    assert out2.shape == (N, P, 4, 8, 9)
    assert jnp.allclose(out2, ref2, atol=1e-4, rtol=1e-4), "mismatch vs reference (ragged)"

    print("KERNEL_OK")
</pallas_src>

<mosaic_0001>
module attributes {stable_mosaic.version = 11 : i64} {
  func.func @_stats_kernel(%arg0: i32, %arg1: i32, %arg2: i32, %arg3: memref<1x16x256xf32, #tpu.memory_space<vmem>>, %arg4: memref<16x16xf32, #tpu.memory_space<vmem>>, %arg5: memref<1x1x16x1xf32, #tpu.memory_space<vmem>>, %arg6: memref<1x1x16x1xf32, #tpu.memory_space<vmem>>) attributes {dimension_semantics = [#tpu.dimension_semantics<parallel>, #tpu.dimension_semantics<parallel>, #tpu.dimension_semantics<arbitrary>], iteration_bounds = array<i64: 2, 1, 1>, scalar_prefetch = 0 : i64, scratch_operands = 0 : i64, tpu.core_type = #tpu.core_type<tc>, window_params = [{transform_indices = @transform_0, window_bounds = array<i64: 1, 16, 256>}, {pipeline_mode = #tpu.pipeline_mode<synchronous>, transform_indices = @transform_1, window_bounds = array<i64: 16, 16>}, {transform_indices = @transform_2, window_bounds = array<i64: 1, 1, 16, 1>}, {transform_indices = @transform_3, window_bounds = array<i64: 1, 1, 16, 1>}]} {
    %c0 = arith.constant 0 : index
    %c0_0 = arith.constant 0 : index
    %0 = vector.load %arg4[%c0, %c0_0] : memref<16x16xf32, #tpu.memory_space<vmem>>, vector<16x16xf32>
    %c0_1 = arith.constant 0 : index
    %c0_2 = arith.constant 0 : index
    %c0_3 = arith.constant 0 : index
    %1 = vector.load %arg3[%c0_1, %c0_2, %c0_3] : memref<1x16x256xf32, #tpu.memory_space<vmem>>, vector<1x16x256xf32>
    %2 = vector.shape_cast %1 : vector<1x16x256xf32> to vector<16x256xf32>
    %cst = arith.constant dense<0.000000e+00> : vector<16x256xf32>
    %3 = tpu.matmul %0, %2, %cst {dimension_numbers = #tpu.dot_dimension_numbers<[1], [0], [0], [1], [0, 0, 1, 1], [], []>} : vector<16x16xf32>, vector<16x256xf32>, vector<16x256xf32> -> vector<16x256xf32>
    %c0_i32 = arith.constant 0 : i32
    %4 = arith.cmpi eq, %arg2, %c0_i32 : i32
    %5 = arith.extui %4 : i1 to i32
    %c0_i32_4 = arith.constant 0 : i32
    %6 = arith.cmpi ne, %5, %c0_i32_4 : i32
    scf.if %6 {
      %cst_23 = arith.constant 0.000000e+00 : f32
      %24 = vector.broadcast %cst_23 : f32 to vector<1x1x16x1xf32>
      %c0_24 = arith.constant 0 : index
      %c0_25 = arith.constant 0 : index
      %c0_26 = arith.constant 0 : index
      %c0_27 = arith.constant 0 : index
      %25 = vector.load %arg5[%c0_24, %c0_25, %c0_26, %c0_27] : memref<1x1x16x1xf32, #tpu.memory_space<vmem>>, vector<1x1x16x1xf32>
      tpu.vector_store %arg5[%c0_24, %c0_25, %c0_26, %c0_27], %24 {strides = array<i32>} : memref<1x1x16x1xf32, #tpu.memory_space<vmem>>, vector<1x1x16x1xf32>,
      %cst_28 = arith.constant 0.000000e+00 : f32
      %26 = vector.broadcast %cst_28 : f32 to vector<1x1x16x1xf32>
      %c0_29 = arith.constant 0 : index
      %c0_30 = arith.constant 0 : index
      %c0_31 = arith.constant 0 : index
      %c0_32 = arith.constant 0 : index
      %27 = vector.load %arg6[%c0_29, %c0_30, %c0_31, %c0_32] : memref<1x1x16x1xf32, #tpu.memory_space<vmem>>, vector<1x1x16x1xf32>
      tpu.vector_store %arg6[%c0_29, %c0_30, %c0_31, %c0_32], %26 {strides = array<i32>} : memref<1x1x16x1xf32, #tpu.memory_space<vmem>>, vector<1x1x16x1xf32>,
    } else {
    }
    %c0_5 = arith.constant 0 : index
    %c0_6 = arith.constant 0 : index
    %c0_7 = arith.constant 0 : index
    %c0_8 = arith.constant 0 : index
    %7 = vector.load %arg5[%c0_5, %c0_6, %c0_7, %c0_8] : memref<1x1x16x1xf32, #tpu.memory_space<vmem>>, vector<1x1x16x1xf32>
    %8 = vector.shape_cast %7 : vector<1x1x16x1xf32> to vector<16x1xf32>
    %cst_9 = arith.constant dense<0.000000e+00> : vector<16xf32>
    %9 = vector.multi_reduction <add>, %3, %cst_9 [1] : vector<16x256xf32> to vector<16xf32>
    %10 = vector.shape_cast %9 : vector<16xf32> to vector<16x1xf32>
    %11 = arith.addf %8, %10 : vector<16x1xf32>
    %c0_10 = arith.constant 0 : index
    %c0_11 = arith.constant 0 : index
    %c0_12 = arith.constant 0 : index
    %c0_13 = arith.constant 0 : index
    %12 = vector.load %arg5[%c0_10, %c0_11, %c0_12, %c0_13] : memref<1x1x16x1xf32, #tpu.memory_space<vmem>>, vector<1x1x16x1xf32>
    %13 = vector.shape_cast %12 : vector<1x1x16x1xf32> to vector<16x1xf32>
    %14 = vector.shape_cast %11 : vector<16x1xf32> to vector<1x1x16x1xf32>
    tpu.vector_store %arg5[%c0_10, %c0_11, %c0_12, %c0_13], %14 {strides = array<i32>} : memref<1x1x16x1xf32, #tpu.memory_space<vmem>>, vector<1x1x16x1xf32>,
    %c0_14 = arith.constant 0 : index
    %c0_15 = arith.constant 0 : index
    %c0_16 = arith.constant 0 : index
    %c0_17 = arith.constant 0 : index
    %15 = vector.load %arg6[%c0_14, %c0_15, %c0_16, %c0_17] : memref<1x1x16x1xf32, #tpu.memory_space<vmem>>, vector<1x1x16x1xf32>
    %16 = vector.shape_cast %15 : vector<1x1x16x1xf32> to vector<16x1xf32>
    %17 = arith.mulf %3, %3 : vector<16x256xf32>
    %cst_18 = arith.constant dense<0.000000e+00> : vector<16xf32>
    %18 = vector.multi_reduction <add>, %17, %cst_18 [1] : vector<16x256xf32> to vector<16xf32>
    %19 = vector.shape_cast %18 : vector<16xf32> to vector<16x1xf32>
    %20 = arith.addf %16, %19 : vector<16x1xf32>
    %c0_19 = arith.constant 0 : index
    %c0_20 = arith.constant 0 : index
    %c0_21 = arith.constant 0 : index
    %c0_22 = arith.constant 0 : index
    %21 = vector.load %arg6[%c0_19, %c0_20, %c0_21, %c0_22] : memref<1x1x16x1xf32, #tpu.memory_space<vmem>>, vector<1x1x16x1xf32>
    %22 = vector.shape_cast %21 : vector<1x1x16x1xf32> to vector<16x1xf32>
    %23 = vector.shape_cast %20 : vector<16x1xf32> to vector<1x1x16x1xf32>
    tpu.vector_store %arg6[%c0_19, %c0_20, %c0_21, %c0_22], %23 {strides = array<i32>} : memref<1x1x16x1xf32, #tpu.memory_space<vmem>>, vector<1x1x16x1xf32>,
    return
  }
  func.func @transform_0(%arg0: i32, %arg1: i32, %arg2: i32) -> (i32, i32, i32) {
    %c1_i32 = arith.constant 1 : i32
    %0 = arith.muli %arg1, %c1_i32 : i32
    %1 = arith.addi %0, %arg2 : i32
    %c0_i32 = arith.constant 0 : i32
    %2 = arith.minsi %1, %c0_i32 : i32
    %c0_i32_0 = arith.constant 0 : i32
    %c0_i32_1 = arith.constant 0 : i32
    return %arg0, %c0_i32_0, %2 : i32, i32, i32
  }
  func.func @transform_1(%arg0: i32, %arg1: i32, %arg2: i32) -> (i32, i32) {
    %c0_i32 = arith.constant 0 : i32
    %c0_i32_0 = arith.constant 0 : i32
    %c0_i32_1 = arith.constant 0 : i32
    return %c0_i32, %c0_i32_0 : i32, i32
  }
  func.func @transform_2(%arg0: i32, %arg1: i32, %arg2: i32) -> (i32, i32, i32, i32) {
    %c0_i32 = arith.constant 0 : i32
    %c0_i32_0 = arith.constant 0 : i32
    %c0_i32_1 = arith.constant 0 : i32
    return %arg0, %arg1, %c0_i32, %c0_i32_0 : i32, i32, i32, i32
  }
  func.func @transform_3(%arg0: i32, %arg1: i32, %arg2: i32) -> (i32, i32, i32, i32) {
    %c0_i32 = arith.constant 0 : i32
    %c0_i32_0 = arith.constant 0 : i32
    %c0_i32_1 = arith.constant 0 : i32
    return %arg0, %arg1, %c0_i32, %c0_i32_0 : i32, i32, i32, i32
  }
}

</mosaic_0001>

<bundles_post_ra>
// kernel: tpu_custom_call.1
= control target key start
LH: loop header
LB: loop body
LE: loop exit
PB: predicated region body
PF: predicated region fallthrough
CT: control target
= control target key end

     0   :  { %9 = vsyncpa [#allocation3], 0  ;;  %s941_s0 = inlined_call_operand.hbm [shape: f32[2,16,256], index: 0, kind: input, shape index: {}]   ;;  %s942_s1 = inlined_call_operand.hbm [shape: f32[16,16], index: 1, kind: input, shape index: {}]   ;;  %s943_s2 = inlined_call_operand.vmem [shape: f32[2,1,16,1], index: 2, kind: output, shape index: {0}]   ;;  %s944_s3 = inlined_call_operand.vmem [shape: f32[2,1,16,1], index: 3, kind: output, shape index: {1}]  }
   0x1   :  { %11 = vsyncpa [#allocation3 + $0x1], 0 }
   0x2   :  { %12 = vsyncpa [#allocation5], 0  ;;  %s801_s12 = smov 0   ;;  %s803_s13 = smov 0  }
   0x3   :  { %s805_s14 = smov 0   ;;  %s807_s15 = smov 0  }
   0x4   :  { %s809_s16 = smov 0   ;;  %s811_s17 = smov 0  }
   0x5 LB: > { %s567_s18 = sadd.s32 4294967295, %s772_s17   ;;  %p65_p0 = scmp.ne.s32.totalorder %s756_s13, %s752_s12  ;;  %s772_s17 = sphi %s811_s17, %s18_s17   ;;  %s768_s16 = sphi %s809_s16, %s954_s16   ;;  %s764_s15 = sphi %s807_s15, %s953_s15   ;;  %s760_s14 = sphi %s805_s14, %s952_s14   ;;  %s756_s13 = sphi %s803_s13, %s951_s13   ;;  %s752_s12 = sphi %s801_s12, %s950_s12  }
   0x6   : > { %p831_p1 = scmp.eq.s32.totalorder %s567_s18, 0  ;;  %p569_p2 = scmp.ge.s32.totalorder %s772_s17, 1 }
   0x7   : > { %p153_p3 = scmp.lt.s32.totalorder %s772_s17, 3  ;;  %s774_s22 = smov [#allocation4]  }
   0x8   : > { %p839_p4 = por %p831_p1, %p65_p0  ;;  %s165_s23 = sshll.u32 %s774_s22, 4  ;;  %s166_s23 = int_to_ptr.vmem [resolvable:$true] %s165_s23 }
   0x9   : > { %p843_p5 = pnand %p569_p2, %p153_p3  ;;  %s37_s25 = sadd.s32 1, %s768_s16 }
   0xa   : > { %s675_s26 = scalar_lea.vmem %s166_s23, 256  ;;  %p683_p12 = scmp.lt.s32.totalorder %s166_s23, %s166_s23 }
   0xb   : > { %p599_p6 = pneg %p843_p5  ;;  %p676_p9 = scmp.ne.s32.totalorder %s166_s23, %s675_s26 }
   0xc   : > { %p684_p13 = scmp.lt.s32.totalorder %s675_s26, %s675_s26 }
   0xd   : > { %p851_p7 = pnand %p599_p6, %p831_p1 }
   0xe   : > { %p685_p0 = por %p684_p13, %p683_p12 }
   0xf   : > { %p666_p8 = pneg %p851_p7 }
  0x11   : > { %p678_p10 = pnand %p676_p9, %p666_p8 }
  0x13   : > { %p679_p11 = pneg %p678_p10 }
  0x15   : > { %p686_p2 = pnand %p685_p0, %p679_p11 }
  0x17   : > { %689 = shalt.err (!%p686_p2)
}
  0x18   : > { %s775_s27 = smov 128   ;;  %s776_s28 = smov 8  }
  0x19   : > { %602 = dma.hbm_to_vmem [thread:$0]  (!%p851_p7), %s942_s1, 256, %s166_s23, [#allocation5], %s775_s27, %s775_s27, %s776_s28  }
  0x1a   : > { %p39_p3 = scmp.ge.s32.totalorder %s37_s25, 2  ;;  %s52_s4 = sadd.s32 1, %s760_s14 }
  0x1b   : > { %p59_p6 = scmp.ne.s32.totalorder %s760_s14, %s756_s13  ;;  %p60_p8 = scmp.eq.s32.totalorder %s772_s17, 0 }
  0x1c   : > { %s956_s25 = smov (%p39_p3, %s37_s25), 0  ;;  %p608_p10 = scmp.lt.s32.totalorder %s772_s17, 2 }
  0x1d   : > { %p61_p9 = por %p60_p8, %p59_p6  ;;  %s47_s5 = ssub.s32 %s768_s16, %s956_s25 }
  0x1e   : > { %s179_s6 = sand.u32 1, %s760_s14   ;;  %p50_p11 = scmp.eq.s32.totalorder %s47_s5, 0 }
  0x1f   : > { %s572_s7 = sshll.u32 %s179_s6, 5  ;;  %s586_s8 = sshll.u32 %s768_s16, 9 }
  0x20   : > { %s875_s9 = scalar_select %p50_p11, %s760_s14, %s52_s4  }
  0x21   : > { %s194_s12 = scalar_lea.hbm %s941_s0, %s586_s8  ;;  %s183_s18 = scalar_lea.vmem [#allocation2], %s572_s7 }
  0x22   : > { %s195_s22 = sshll.u32 %s183_s18, 4  ;;  %p880_p7 = pnand %p608_p10, %p61_p9  ;;  %s196_s22 = int_to_ptr.vmem [resolvable:$true] %s195_s22 }
  0x23   : > { %s180_s24 = scalar_lea.sflag [#allocation3], %s179_s6  ;;  %s703_s26 = scalar_lea.vmem %s196_s22, 512 }
  0x24   : > { %p692_p12 = pneg %p880_p7  ;;  %p704_p13 = scmp.ne.s32.totalorder %s196_s22, %s703_s26 }
  0x25   : > { %s777_s27 = smov [#allocation2]  }
  0x26   : > { %p706_p0 = pnand %p704_p13, %p692_p12  ;;  %s708_s28 = sshll.u32 %s777_s27, 4  ;;  %s709_s28 = int_to_ptr.vmem [resolvable:$false] %s708_s28 }
  0x27   : > { %s710_s29 = scalar_lea.vmem %s709_s28, 1024  ;;  %p711_p3 = scmp.lt.s32.totalorder %s196_s22, %s709_s28 }
  0x28   : > { %p707_p2 = pneg %p706_p0  ;;  %p712_p6 = scmp.lt.s32.totalorder %s710_s29, %s703_s26 }
  0x2a   : > { %p713_p8 = por %p712_p6, %p711_p3 }
  0x2c   : > { %p714_p9 = pnand %p713_p8, %p707_p2 }
  0x2e   : > { %717 = shalt.err (!%p714_p9)
}
  0x2f   : > { %s778_s30 = smov 256   ;;  %s779_s4 = smov 16  }
  0x30   : > { %606 = dma.hbm_to_vmem [thread:$0]  (!%p880_p7), %s194_s12, 512, %s196_s22, %s180_s24, %s778_s30, %s778_s30, %s779_s4  }
  0x31   : > { %207 = sbr.rel (%p843_p5) target bundleno = 407 (0x197), region = 28  ;;  %s209_s5 = sand.u32 (!%p843_p5), 1, %s756_s13  }
  0x32   : > { %s576_s6 = sshll.u32 (!%p843_p5), %s209_s5, 5  ;;  %s210_s7 = scalar_lea.sflag (!%p843_p5), [#allocation3], %s209_s5 }
  0x33   : > { %s213_s8 = scalar_lea.vmem (!%p843_p5), [#allocation2], %s576_s6 }
  0x36   : > { %743 = dma.done.wait (%p839_p4), %s210_s7, 512  }
  0x37   : > { %745 = vsyncadd (%p839_p4), %s210_s7, 4294966784 }
  0x38   : > { %747 = dma.done.wait (%p831_p1), [#allocation5], 256  }
  0x39   : > { %749 = vsyncadd (%p831_p1), [#allocation5], 4294967040  ;;  %v780_v0 = vmov 0.0   ;;  %v280_v1 = vld [vmem:[%s213_s8 + $0x18] sm:$0xff]  ;;  %v279_v2 = vld [vmem:[%s213_s8 + $0x10] sm:$0xff]  ;;  %vm281_vm0 = vcmask 130048  }
  0x3a   : > { %352 = vmatprep.mubr.f32.mxu0 %v780_v0  ;;  %358 = vmatprep.mubr.f32.mxu1 %v780_v0  ;;  %v278_v3 = vld [vmem:[%s213_s8 + $0x8] sm:$0xff]  ;;  %v277_v4 = vld [vmem:[%s213_s8] sm:$0xff]  ;;  %p257_p1 = scmp.lt.s32.totalorder %s764_s15, 1  ;;  %vm369_vm1 = vcmask 7168  }
  0x3b   : > { %316 = vmatprep.subr.mxu0 %v280_v1  ;;  %589 = vmatprep.subr.mxu1 %v280_v1  ;;  %v275_v5 = vld [vmem:[#allocation4] sm:$0xff]  ;;  %v276_v6 = vld [vmem:[#allocation4 + $0x8] sm:$0xff] }
  0x3c   : > { %317 = vmatpush1.msra.mxu0 %v279_v2  ;;  %591 = vmatpush1.msra.mxu1 %v279_v2  ;;  %s958_s15 = smov (!%p257_p1, %s764_s15), 1 }
  0x3d   : > { %318 = vmatprep.subr.mxu0 %v278_v3  ;;  %590 = vmatprep.subr.mxu1 %v278_v3  ;;  %s587_s19 = sshll.u32 %s958_s15, 4 }
  0x3e   : > { %319 = vmatpush1.msra.mxu0 %v277_v4  ;;  %592 = vmatpush1.msra.mxu1 %v277_v4  ;;  %s904_s10 = scalar_lea.vmem %s943_s2, %s587_s19  ;;  %s274_s12 = scalar_lea.vmem %s944_s3, %s587_s19 }
  0x3f   : > { %582 = vmatmul.mubr.msk.f32.vlgmr.msra.gmra.mxu0 %vm281_vm0, %v275_v5  ;;  %583 = vmatmul.mubr.msk.f32.vlgmr.msra.gmra.mxu1 %vm281_vm0, %v276_v6  ;;  %370 = vst.msk [vmem:[%s904_s10] sm:$0xff] %vm369_vm1, %v780_v0  ;;  %371 = vst.msk [vmem:[%s904_s10 + $0x8] sm:$0xff] %vm369_vm1, %v780_v0 }
  0x40   : > { %372 = vst.msk [vmem:[%s274_s12] sm:$0xff] %vm369_vm1, %v780_v0  ;;  %373 = vst.msk [vmem:[%s274_s12 + $0x8] sm:$0xff] %vm369_vm1, %v780_v0 }
  0x46   : > { %v374_v19 = vld [vmem:[%s904_s10] sm:$0xff]  ;;  %v375_v24 = vld [vmem:[%s904_s10 + $0x8] sm:$0xff] }
  0x47   : > { %v387_v21 = vld [vmem:[%s274_s12] sm:$0xff]  ;;  %v388_v27 = vld [vmem:[%s274_s12 + $0x8] sm:$0xff] }
  0xff   : > { %v354_v7 = vpop.f32.mrf.mxu0  ;;  %v360_v8 = vpop.f32.mrf.mxu1 }
 0x100   : > { %v389_v11 = vmul.f32 %v354_v7, %v354_v7  ;;  %v391_v14 = vmul.f32 %v360_v8, %v360_v8 }
 0x101   : > { %v356_v9 = vpop.f32.mrf.mxu0  ;;  %v362_v10 = vpop.f32.mrf.mxu1 }
 0x102   : > { %v390_v12 = vmul.f32 %v356_v9, %v356_v9  ;;  %v376_v13 = vadd.f32 %v356_v9, %v354_v7  ;;  %v392_v15 = vmul.f32 %v362_v10, %v362_v10  ;;  %v379_v17 = vadd.f32 %v362_v10, %v360_v8 }
 0x104   : > { %377 = vadd.xlane.f32.xlu0 %v376_v13  ;;  %v393_v16 = vadd.f32 %v390_v12, %v389_v11  ;;  %v396_v18 = vadd.f32 %v392_v15, %v391_v14 }
 0x106   : > { %394 = vadd.xlane.f32.xlu1 %v393_v16 }
 0x108   : > { %380 = vadd.xlane.f32.xlu0 %v379_v17 }
 0x10a   : > { %397 = vadd.xlane.f32.xlu1 %v396_v18 }
 0x18d   : > { %v378_v20 = vpop.xlane.xlu0 %377 }
 0x18e   : > { %v382_v22 = vadd.f32 %v378_v20, %v374_v19 }
 0x18f   : > { %v395_v23 = vpop.xlane.xlu1 %394 }
 0x190   : > { %385 = vst.msk [vmem:[%s904_s10] sm:$0xff] %vm369_vm1, %v382_v22  ;;  %v399_v25 = vadd.f32 %v395_v23, %v387_v21 }
 0x191   : > { %v381_v26 = vpop.xlane.xlu0 %380 }
 0x192   : > { %401 = vst.msk [vmem:[%s274_s12] sm:$0xff] %vm369_vm1, %v399_v25  ;;  %v383_v28 = vadd.f32 %v381_v26, %v375_v24 }
 0x193   : > { %v398_v29 = vpop.xlane.xlu1 %397 }
 0x194   : > { %386 = vst.msk [vmem:[%s904_s10 + $0x8] sm:$0xff] %vm369_vm1, %v383_v28  ;;  %v400_v30 = vadd.f32 %v398_v29, %v388_v27 }
 0x196   : > { %402 = vst.msk [vmem:[%s274_s12 + $0x8] sm:$0xff] %vm369_vm1, %v400_v30 }
 0x197 PF: > { %s18_s17 = sadd.s32 1, %s772_s17   ;;  %s950_s12 = smov %s756_s13 }
 0x198   : > { %p15_p4 = scmp.ge.s32.totalorder %s18_s17, 4   ;;  %s951_s13 = smov %s760_s14 }
 0x199   : > { %s952_s14 = smov %s875_s9  ;;  %s953_s15 = smov %s768_s16 }
 0x19a   : > { %s954_s16 = smov %s956_s25  ;;  %17 = sbr.rel (!%p15_p4) target bundleno = 5 (0x5), region = 88 }
 0x19f   :  { %456 = vsyncpa [#allocation3], 1 }
 0x1a0   :  { %458 = vsyncpa [#allocation3 + $0x1], 1 }
 0x1a1   :  { %459 = vsyncpa [#allocation5], 1 }

</bundles_post_ra>
